<compile_context>
chip_gen: v5e
topology: v5e:2x2
jax: 0.10.0
libtpu: 0.0.40
codegen_flags: <defaults>
</compile_context>

<pallas_src>
import functools

import jax
import jax.numpy as jnp
from jax.experimental import pallas as pl
from jax.experimental.pallas import tpu as pltpu


OUT_PAD = 128  # lane-dense padding for the 2-wide wik head output.


# ----------------------------------------------------------------------------
# Pallas kernel: one grid step == one batch tile (whole batch at test sizes).
# ----------------------------------------------------------------------------
def _encoder_head_kernel(x_flat_ref,                  # (BT*S, H) all token embeddings
                         x0_ref,                      # (BT, H)   token-0 embeddings
                         wq_ref, wk_ref, wv_ref, wo_ref,   # (H, H) each
                         ln1_g_ref, ln1_b_ref,        # (1, H)
                         w1_ref,                      # (H, F)
                         w2_ref,                      # (F, H)
                         ln2_g_ref, ln2_b_ref,        # (1, H)
                         wik_ref,                     # (H, OUT_PAD)
                         out_ref,                     # (BT, OUT_PAD)
                         *, seq_len, hidden):
    f32 = jnp.float32
    x_flat = x_flat_ref[...].astype(f32)              # (BT*S, H)
    x0 = x0_ref[...].astype(f32)                      # (BT, H)
    bt = x0.shape[0]
    n_kv = x_flat.shape[0]                            # BT*S

    def mm(a, b):
        return jnp.dot(a, b, preferred_element_type=f32)

    # --- projections, folded over the whole batch tile (single MXU matmuls) ---
    k = mm(x_flat, wk_ref[...])                       # (BT*S, H)
    v = mm(x_flat, wv_ref[...])                       # (BT*S, H)
    q = mm(x0, wq_ref[...])                           # (BT, H)  only token 0 needed

    # --- token-0 attention over every key row, masked to own batch block ---
    scale = 1.0 / float(hidden) ** 0.5                # static python scalar
    scores = jax.lax.dot_general(                     # contract on H, no k.T
        q, k, dimension_numbers=(((1,), (1,)), ((), ())),
        preferred_element_type=f32) * scale           # (BT, BT*S)
    row = jax.lax.broadcasted_iota(jnp.int32, (bt, n_kv), 0)
    col = jax.lax.broadcasted_iota(jnp.int32, (bt, n_kv), 1)
    in_batch = (col >= row * seq_len) & (col < (row + 1) * seq_len)
    masked = jnp.where(in_batch, scores, -jnp.inf)
    m = jnp.max(masked, axis=-1, keepdims=True)
    p = jnp.exp(masked - m)                           # exactly 0 off-batch
    denom = jnp.sum(p, axis=-1, keepdims=True)
    attn = p * pl.reciprocal(denom, approx=True)      # EUP reciprocal
    ctx = mm(attn, v)                                 # (BT, H)
    attn_out = mm(ctx, wo_ref[...])                   # (BT, H)

    # --- layernorm params hoisted once ---
    ln1_g = ln1_g_ref[...]
    ln1_b = ln1_b_ref[...]
    ln2_g = ln2_g_ref[...]
    ln2_b = ln2_b_ref[...]

    def layernorm(y, g, b):
        mu = jnp.mean(y, axis=-1, keepdims=True)
        var = jnp.mean((y - mu) ** 2, axis=-1, keepdims=True)
        return (y - mu) * jax.lax.rsqrt(var + 1e-5) * g + b

    x1 = layernorm(x0 + attn_out, ln1_g, ln1_b)       # (BT, H)

    # --- feed-forward on token-0 rows only ---
    h = jax.nn.gelu(mm(x1, w1_ref[...]))              # (BT, F)
    ffn = mm(h, w2_ref[...])                          # (BT, H)
    x2 = layernorm(x1 + ffn, ln2_g, ln2_b)            # (BT, H) == last_hidden[:,0]

    # --- wik head, lane-dense padded store ---
    out_ref[...] = mm(x2, wik_ref[...]).astype(out_ref.dtype)   # (BT, OUT_PAD)


# ----------------------------------------------------------------------------
# Wrapper
# ----------------------------------------------------------------------------
def calibration_encoder_forward(input_ids, params):
    """input_ids: (B, S) int32 -> logits (B, 2) float32."""
    emb = params["emb"]                        # (V, H)
    B, S = input_ids.shape
    H = emb.shape[1]
    F = params["w1"].shape[1]

    # Glue (plain JAX): embedding gather, batch flattening, token-0 slice,
    # and zero-padding the 2-wide head to a lane-dense 128-wide weight.
    x = emb[input_ids].astype(jnp.float32)     # (B, S, H)
    x_flat = x.reshape(B * S, H)               # feeds K/V projections
    x_tok0 = x[:, 0, :]                        # feeds Q / residual / FFN / head
    wik = params["wik"]                        # (H, 2)
    wik_pad = jnp.zeros((H, OUT_PAD), jnp.float32).at[:, : wik.shape[1]].set(wik)

    # Batch tile: whole batch per grid step at these sizes.  For large B pick
    # BT so BT*S >= 128 (v5e) / 256 (v6e, v7x) rows and BT % 8 == 0.
    BT = B
    num_blocks = B // BT

    def full_spec(shape):
        nd = len(shape)
        return pl.BlockSpec(shape, lambda b, _nd=nd: (0,) * _nd)

    in_specs = [
        pl.BlockSpec((BT * S, H), lambda b: (b, 0)),    # x_flat
        pl.BlockSpec((BT, H), lambda b: (b, 0)),        # x_tok0
        full_spec((H, H)),                              # wq
        full_spec((H, H)),                              # wk
        full_spec((H, H)),                              # wv
        full_spec((H, H)),                              # wo
        full_spec((1, H)),                              # ln1_g
        full_spec((1, H)),                              # ln1_b
        full_spec((H, F)),                              # w1
        full_spec((F, H)),                              # w2
        full_spec((1, H)),                              # ln2_g
        full_spec((1, H)),                              # ln2_b
        full_spec((H, OUT_PAD)),                        # wik (padded)
    ]
    out_spec = pl.BlockSpec((BT, OUT_PAD), lambda b: (b, 0))

    kernel = functools.partial(_encoder_head_kernel, seq_len=S, hidden=H)
    out = pl.pallas_call(
        kernel,
        out_shape=jax.ShapeDtypeStruct((B, OUT_PAD), jnp.float32),
        grid_spec=pltpu.PrefetchScalarGridSpec(
            num_scalar_prefetch=0,
            grid=(num_blocks,),
            in_specs=in_specs,
            out_specs=out_spec,
        ),
        compiler_params=pltpu.CompilerParams(
            dimension_semantics=("parallel",)),
    )(x_flat, x_tok0,
      params["wq"], params["wk"], params["wv"], params["wo"],
      params["ln1_g"], params["ln1_b"],
      params["w1"], params["w2"],
      params["ln2_g"], params["ln2_b"],
      wik_pad)
    return out[:, :2]                          # (B, 2)


# ----------------------------------------------------------------------------
# Pure-JAX reference (same math, full-sequence formulation) for verification.
# ----------------------------------------------------------------------------
def reference_forward(input_ids, params):
    x = params["emb"][input_ids].astype(jnp.float32)   # (B, S, H)
    H = x.shape[-1]
    q = x @ params["wq"]
    k = x @ params["wk"]
    v = x @ params["wv"]
    scores = jnp.einsum("bqh,bkh->bqk", q, k) / jnp.sqrt(jnp.float32(H))
    attn = jax.nn.softmax(scores, axis=-1)
    attn_out = jnp.einsum("bqk,bkh->bqh", attn, v) @ params["wo"]

    def layernorm(y, g, b):
        mu = jnp.mean(y, axis=-1, keepdims=True)
        var = jnp.mean((y - mu) ** 2, axis=-1, keepdims=True)
        return (y - mu) * jax.lax.rsqrt(var + 1e-5) * g + b

    x1 = layernorm(x + attn_out, params["ln1_g"], params["ln1_b"])
    ffn = jax.nn.gelu(x1 @ params["w1"]) @ params["w2"]
    x2 = layernorm(x1 + ffn, params["ln2_g"], params["ln2_b"])
    logits = (x2 @ params["wik"])[:, 0]                 # (B, 2)
    return logits


# ----------------------------------------------------------------------------
# Main
# ----------------------------------------------------------------------------
if __name__ == "__main__":
    B, S, H, F, V = 2, 8, 32, 64, 50

    key = jax.random.PRNGKey(0)
    keys = jax.random.split(key, 10)

    params = {
        "emb":  jax.random.normal(keys[0], (V, H), jnp.float32) * 0.1,
        "wq":   jax.random.normal(keys[1], (H, H), jnp.float32) * 0.1,
        "wk":   jax.random.normal(keys[2], (H, H), jnp.float32) * 0.1,
        "wv":   jax.random.normal(keys[3], (H, H), jnp.float32) * 0.1,
        "wo":   jax.random.normal(keys[4], (H, H), jnp.float32) * 0.1,
        "ln1_g": jnp.ones((1, H), jnp.float32),
        "ln1_b": jnp.zeros((1, H), jnp.float32),
        "w1":   jax.random.normal(keys[5], (H, F), jnp.float32) * 0.1,
        "w2":   jax.random.normal(keys[6], (F, H), jnp.float32) * 0.1,
        "ln2_g": jnp.ones((1, H), jnp.float32),
        "ln2_b": jnp.zeros((1, H), jnp.float32),
        # NOTE: the reference __init__ zero-fills wik; a small deterministic
        # random init is used here so the head matmul is actually exercised.
        "wik":  jax.random.normal(keys[7], (H, 2), jnp.float32) * 0.1,
    }

    input_ids = jax.random.randint(keys[8], (B, S), 0, V, dtype=jnp.int32)

    logits = calibration_encoder_forward(input_ids, params)
    logits = jax.block_until_ready(logits)

    ref = reference_forward(input_ids, params)
    assert logits.shape == (B, 2), logits.shape
    # Tolerance loosened slightly vs. 1e-4 because the softmax denominator
    # uses the approximate EUP reciprocal (pl.reciprocal(approx=True)).
    assert jnp.allclose(logits, ref, atol=2e-3, rtol=2e-3), (logits, ref)

    print("KERNEL_OK")
</pallas_src>

<mosaic_0001>
module attributes {stable_mosaic.version = 11 : i64} {
  func.func @_encoder_head_kernel(%arg0: i32, %arg1: memref<16x32xf32, #tpu.memory_space<vmem>>, %arg2: memref<2x32xf32, #tpu.memory_space<vmem>>, %arg3: memref<32x32xf32, #tpu.memory_space<vmem>>, %arg4: memref<32x32xf32, #tpu.memory_space<vmem>>, %arg5: memref<32x32xf32, #tpu.memory_space<vmem>>, %arg6: memref<32x32xf32, #tpu.memory_space<vmem>>, %arg7: memref<1x32xf32, #tpu.memory_space<vmem>>, %arg8: memref<1x32xf32, #tpu.memory_space<vmem>>, %arg9: memref<32x64xf32, #tpu.memory_space<vmem>>, %arg10: memref<64x32xf32, #tpu.memory_space<vmem>>, %arg11: memref<1x32xf32, #tpu.memory_space<vmem>>, %arg12: memref<1x32xf32, #tpu.memory_space<vmem>>, %arg13: memref<32x128xf32, #tpu.memory_space<vmem>>, %arg14: memref<2x128xf32, #tpu.memory_space<vmem>>) attributes {dimension_semantics = [#tpu.dimension_semantics<parallel>], iteration_bounds = array<i64: 1>, scalar_prefetch = 0 : i64, scratch_operands = 0 : i64, tpu.core_type = #tpu.core_type<tc>, window_params = [{transform_indices = @transform_0, window_bounds = array<i64: 16, 32>}, {transform_indices = @transform_1, window_bounds = array<i64: 2, 32>}, {pipeline_mode = #tpu.pipeline_mode<synchronous>, transform_indices = @transform_2, window_bounds = array<i64: 32, 32>}, {pipeline_mode = #tpu.pipeline_mode<synchronous>, transform_indices = @transform_3, window_bounds = array<i64: 32, 32>}, {pipeline_mode = #tpu.pipeline_mode<synchronous>, transform_indices = @transform_4, window_bounds = array<i64: 32, 32>}, {pipeline_mode = #tpu.pipeline_mode<synchronous>, transform_indices = @transform_5, window_bounds = array<i64: 32, 32>}, {pipeline_mode = #tpu.pipeline_mode<synchronous>, transform_indices = @transform_6, window_bounds = array<i64: 1, 32>}, {pipeline_mode = #tpu.pipeline_mode<synchronous>, transform_indices = @transform_7, window_bounds = array<i64: 1, 32>}, {pipeline_mode = #tpu.pipeline_mode<synchronous>, transform_indices = @transform_8, window_bounds = array<i64: 32, 64>}, {pipeline_mode = #tpu.pipeline_mode<synchronous>, transform_indices = @transform_9, window_bounds = array<i64: 64, 32>}, {pipeline_mode = #tpu.pipeline_mode<synchronous>, transform_indices = @transform_10, window_bounds = array<i64: 1, 32>}, {pipeline_mode = #tpu.pipeline_mode<synchronous>, transform_indices = @transform_11, window_bounds = array<i64: 1, 32>}, {pipeline_mode = #tpu.pipeline_mode<synchronous>, transform_indices = @transform_12, window_bounds = array<i64: 32, 128>}, {transform_indices = @transform_13, window_bounds = array<i64: 2, 128>}]} {
    %c0 = arith.constant 0 : index
    %c0_0 = arith.constant 0 : index
    %0 = vector.load %arg1[%c0, %c0_0] : memref<16x32xf32, #tpu.memory_space<vmem>>, vector<16x32xf32>
    %c0_1 = arith.constant 0 : index
    %c0_2 = arith.constant 0 : index
    %1 = vector.load %arg2[%c0_1, %c0_2] : memref<2x32xf32, #tpu.memory_space<vmem>>, vector<2x32xf32>
    %c0_3 = arith.constant 0 : index
    %c0_4 = arith.constant 0 : index
    %2 = vector.load %arg4[%c0_3, %c0_4] : memref<32x32xf32, #tpu.memory_space<vmem>>, vector<32x32xf32>
    %cst = arith.constant dense<0.000000e+00> : vector<16x32xf32>
    %3 = tpu.matmul %0, %2, %cst {dimension_numbers = #tpu.dot_dimension_numbers<[1], [0], [0], [1], [0, 0, 1, 1], [], []>} : vector<16x32xf32>, vector<32x32xf32>, vector<16x32xf32> -> vector<16x32xf32>
    %c0_5 = arith.constant 0 : index
    %c0_6 = arith.constant 0 : index
    %4 = vector.load %arg5[%c0_5, %c0_6] : memref<32x32xf32, #tpu.memory_space<vmem>>, vector<32x32xf32>
    %cst_7 = arith.constant dense<0.000000e+00> : vector<16x32xf32>
    %5 = tpu.matmul %0, %4, %cst_7 {dimension_numbers = #tpu.dot_dimension_numbers<[1], [0], [0], [1], [0, 0, 1, 1], [], []>} : vector<16x32xf32>, vector<32x32xf32>, vector<16x32xf32> -> vector<16x32xf32>
    %c0_8 = arith.constant 0 : index
    %c0_9 = arith.constant 0 : index
    %6 = vector.load %arg3[%c0_8, %c0_9] : memref<32x32xf32, #tpu.memory_space<vmem>>, vector<32x32xf32>
    %cst_10 = arith.constant dense<0.000000e+00> : vector<2x32xf32>
    %7 = tpu.matmul %1, %6, %cst_10 {dimension_numbers = #tpu.dot_dimension_numbers<[1], [0], [0], [1], [0, 0, 1, 1], [], []>} : vector<2x32xf32>, vector<32x32xf32>, vector<2x32xf32> -> vector<2x32xf32>
    %cst_11 = arith.constant dense<0.000000e+00> : vector<2x16xf32>
    %8 = tpu.matmul %7, %3, %cst_11 {dimension_numbers = #tpu.dot_dimension_numbers<[1], [1], [0], [0], [0, 0, 1, 0], [], []>} : vector<2x32xf32>, vector<16x32xf32>, vector<2x16xf32> -> vector<2x16xf32>
    %cst_12 = arith.constant 0.176776692 : f32
    %9 = vector.broadcast %cst_12 : f32 to vector<2x16xf32>
    %10 = arith.mulf %8, %9 : vector<2x16xf32>
    %11 = tpu.iota {dimensions = array<i32: 0>} : vector<2x16xi32>
    %12 = tpu.iota {dimensions = array<i32: 1>} : vector<2x16xi32>
    %c8_i32 = arith.constant 8 : i32
    %13 = vector.broadcast %c8_i32 : i32 to vector<2x16xi32>
    %14 = arith.muli %11, %13 : vector<2x16xi32>
    %15 = arith.cmpi sge, %12, %14 : vector<2x16xi32>
    %c1_i32 = arith.constant 1 : i32
    %16 = vector.broadcast %c1_i32 : i32 to vector<2x16xi32>
    %17 = arith.addi %11, %16 : vector<2x16xi32>
    %c8_i32_13 = arith.constant 8 : i32
    %18 = vector.broadcast %c8_i32_13 : i32 to vector<2x16xi32>
    %19 = arith.muli %17, %18 : vector<2x16xi32>
    %20 = arith.cmpi slt, %12, %19 : vector<2x16xi32>
    %21 = arith.andi %15, %20 : vector<2x16xi1>
    %cst_14 = arith.constant 0xFF800000 : f32
    %22 = vector.broadcast %cst_14 : f32 to vector<2x16xf32>
    %23 = arith.select %21, %10, %22 : vector<2x16xi1>, vector<2x16xf32>
    %cst_15 = arith.constant dense<0xFF800000> : vector<2xf32>
    %24 = vector.multi_reduction <maximumf>, %23, %cst_15 [1] : vector<2x16xf32> to vector<2xf32>
    %25 = vector.shape_cast %24 : vector<2xf32> to vector<2x1xf32>
    %26 = vector.broadcast %25 : vector<2x1xf32> to vector<2x16xf32>
    %27 = arith.subf %23, %26 : vector<2x16xf32>
    %28 = math.exp %27 : vector<2x16xf32>
    %cst_16 = arith.constant dense<0.000000e+00> : vector<2xf32>
    %29 = vector.multi_reduction <add>, %28, %cst_16 [1] : vector<2x16xf32> to vector<2xf32>
    %30 = vector.shape_cast %29 : vector<2xf32> to vector<2x1xf32>
    %31 = tpu.reciprocal %30 {approx = true} : vector<2x1xf32> -> vector<2x1xf32>
    %32 = vector.broadcast %31 : vector<2x1xf32> to vector<2x16xf32>
    %33 = arith.mulf %28, %32 : vector<2x16xf32>
    %cst_17 = arith.constant dense<0.000000e+00> : vector<2x32xf32>
    %34 = tpu.matmul %33, %5, %cst_17 {dimension_numbers = #tpu.dot_dimension_numbers<[1], [0], [0], [1], [0, 0, 1, 1], [], []>} : vector<2x16xf32>, vector<16x32xf32>, vector<2x32xf32> -> vector<2x32xf32>
    %c0_18 = arith.constant 0 : index
    %c0_19 = arith.constant 0 : index
    %35 = vector.load %arg6[%c0_18, %c0_19] : memref<32x32xf32, #tpu.memory_space<vmem>>, vector<32x32xf32>
    %cst_20 = arith.constant dense<0.000000e+00> : vector<2x32xf32>
    %36 = tpu.matmul %34, %35, %cst_20 {dimension_numbers = #tpu.dot_dimension_numbers<[1], [0], [0], [1], [0, 0, 1, 1], [], []>} : vector<2x32xf32>, vector<32x32xf32>, vector<2x32xf32> -> vector<2x32xf32>
    %c0_21 = arith.constant 0 : index
    %c0_22 = arith.constant 0 : index
    %37 = vector.load %arg7[%c0_21, %c0_22] : memref<1x32xf32, #tpu.memory_space<vmem>>, vector<1x32xf32>
    %c0_23 = arith.constant 0 : index
    %c0_24 = arith.constant 0 : index
    %38 = vector.load %arg8[%c0_23, %c0_24] : memref<1x32xf32, #tpu.memory_space<vmem>>, vector<1x32xf32>
    %c0_25 = arith.constant 0 : index
    %c0_26 = arith.constant 0 : index
    %39 = vector.load %arg11[%c0_25, %c0_26] : memref<1x32xf32, #tpu.memory_space<vmem>>, vector<1x32xf32>
    %c0_27 = arith.constant 0 : index
    %c0_28 = arith.constant 0 : index
    %40 = vector.load %arg12[%c0_27, %c0_28] : memref<1x32xf32, #tpu.memory_space<vmem>>, vector<1x32xf32>
    %41 = arith.addf %1, %36 : vector<2x32xf32>
    %cst_29 = arith.constant dense<0.000000e+00> : vector<2xf32>
    %42 = vector.multi_reduction <add>, %41, %cst_29 [1] : vector<2x32xf32> to vector<2xf32>
    %43 = vector.shape_cast %42 : vector<2xf32> to vector<2x1xf32>
    %cst_30 = arith.constant 3.200000e+01 : f32
    %44 = vector.broadcast %cst_30 : f32 to vector<2x1xf32>
    %45 = arith.divf %43, %44 : vector<2x1xf32>
    %46 = vector.broadcast %45 : vector<2x1xf32> to vector<2x32xf32>
    %47 = arith.subf %41, %46 : vector<2x32xf32>
    %48 = arith.mulf %47, %47 : vector<2x32xf32>
    %cst_31 = arith.constant dense<0.000000e+00> : vector<2xf32>
    %49 = vector.multi_reduction <add>, %48, %cst_31 [1] : vector<2x32xf32> to vector<2xf32>
    %50 = vector.shape_cast %49 : vector<2xf32> to vector<2x1xf32>
    %cst_32 = arith.constant 3.200000e+01 : f32
    %51 = vector.broadcast %cst_32 : f32 to vector<2x1xf32>
    %52 = arith.divf %50, %51 : vector<2x1xf32>
    %53 = vector.broadcast %45 : vector<2x1xf32> to vector<2x32xf32>
    %54 = arith.subf %41, %53 : vector<2x32xf32>
    %cst_33 = arith.constant 9.99999974E-6 : f32
    %55 = vector.broadcast %cst_33 : f32 to vector<2x1xf32>
    %56 = arith.addf %52, %55 : vector<2x1xf32>
    %57 = math.rsqrt %56 : vector<2x1xf32>
    %58 = vector.broadcast %57 : vector<2x1xf32> to vector<2x32xf32>
    %59 = arith.mulf %54, %58 : vector<2x32xf32>
    %60 = vector.broadcast %37 : vector<1x32xf32> to vector<2x32xf32>
    %61 = arith.mulf %59, %60 : vector<2x32xf32>
    %62 = vector.broadcast %38 : vector<1x32xf32> to vector<2x32xf32>
    %63 = arith.addf %61, %62 : vector<2x32xf32>
    %c0_34 = arith.constant 0 : index
    %c0_35 = arith.constant 0 : index
    %64 = vector.load %arg9[%c0_34, %c0_35] : memref<32x64xf32, #tpu.memory_space<vmem>>, vector<32x64xf32>
    %cst_36 = arith.constant dense<0.000000e+00> : vector<2x64xf32>
    %65 = tpu.matmul %63, %64, %cst_36 {dimension_numbers = #tpu.dot_dimension_numbers<[1], [0], [0], [1], [0, 0, 1, 1], [], []>} : vector<2x32xf32>, vector<32x64xf32>, vector<2x64xf32> -> vector<2x64xf32>
    %66 = arith.mulf %65, %65 : vector<2x64xf32>
    %67 = arith.mulf %65, %66 : vector<2x64xf32>
    %cst_37 = arith.constant 4.471500e-02 : f32
    %68 = vector.broadcast %cst_37 : f32 to vector<2x64xf32>
    %69 = arith.mulf %68, %67 : vector<2x64xf32>
    %70 = arith.addf %65, %69 : vector<2x64xf32>
    %cst_38 = arith.constant 0.797884583 : f32
    %71 = vector.broadcast %cst_38 : f32 to vector<2x64xf32>
    %72 = arith.mulf %71, %70 : vector<2x64xf32>
    %73 = math.tanh %72 : vector<2x64xf32>
    %cst_39 = arith.constant 1.000000e+00 : f32
    %74 = vector.broadcast %cst_39 : f32 to vector<2x64xf32>
    %75 = arith.addf %74, %73 : vector<2x64xf32>
    %cst_40 = arith.constant 5.000000e-01 : f32
    %76 = vector.broadcast %cst_40 : f32 to vector<2x64xf32>
    %77 = arith.mulf %76, %75 : vector<2x64xf32>
    %78 = arith.mulf %65, %77 : vector<2x64xf32>
    %c0_41 = arith.constant 0 : index
    %c0_42 = arith.constant 0 : index
    %79 = vector.load %arg10[%c0_41, %c0_42] : memref<64x32xf32, #tpu.memory_space<vmem>>, vector<64x32xf32>
    %cst_43 = arith.constant dense<0.000000e+00> : vector<2x32xf32>
    %80 = tpu.matmul %78, %79, %cst_43 {dimension_numbers = #tpu.dot_dimension_numbers<[1], [0], [0], [1], [0, 0, 1, 1], [], []>} : vector<2x64xf32>, vector<64x32xf32>, vector<2x32xf32> -> vector<2x32xf32>
    %81 = arith.addf %63, %80 : vector<2x32xf32>
    %cst_44 = arith.constant dense<0.000000e+00> : vector<2xf32>
    %82 = vector.multi_reduction <add>, %81, %cst_44 [1] : vector<2x32xf32> to vector<2xf32>
    %83 = vector.shape_cast %82 : vector<2xf32> to vector<2x1xf32>
    %cst_45 = arith.constant 3.200000e+01 : f32
    %84 = vector.broadcast %cst_45 : f32 to vector<2x1xf32>
    %85 = arith.divf %83, %84 : vector<2x1xf32>
    %86 = vector.broadcast %85 : vector<2x1xf32> to vector<2x32xf32>
    %87 = arith.subf %81, %86 : vector<2x32xf32>
    %88 = arith.mulf %87, %87 : vector<2x32xf32>
    %cst_46 = arith.constant dense<0.000000e+00> : vector<2xf32>
    %89 = vector.multi_reduction <add>, %88, %cst_46 [1] : vector<2x32xf32> to vector<2xf32>
    %90 = vector.shape_cast %89 : vector<2xf32> to vector<2x1xf32>
    %cst_47 = arith.constant 3.200000e+01 : f32
    %91 = vector.broadcast %cst_47 : f32 to vector<2x1xf32>
    %92 = arith.divf %90, %91 : vector<2x1xf32>
    %93 = vector.broadcast %85 : vector<2x1xf32> to vector<2x32xf32>
    %94 = arith.subf %81, %93 : vector<2x32xf32>
    %cst_48 = arith.constant 9.99999974E-6 : f32
    %95 = vector.broadcast %cst_48 : f32 to vector<2x1xf32>
    %96 = arith.addf %92, %95 : vector<2x1xf32>
    %97 = math.rsqrt %96 : vector<2x1xf32>
    %98 = vector.broadcast %97 : vector<2x1xf32> to vector<2x32xf32>
    %99 = arith.mulf %94, %98 : vector<2x32xf32>
    %100 = vector.broadcast %39 : vector<1x32xf32> to vector<2x32xf32>
    %101 = arith.mulf %99, %100 : vector<2x32xf32>
    %102 = vector.broadcast %40 : vector<1x32xf32> to vector<2x32xf32>
    %103 = arith.addf %101, %102 : vector<2x32xf32>
    %c0_49 = arith.constant 0 : index
    %c0_50 = arith.constant 0 : index
    %104 = vector.load %arg13[%c0_49, %c0_50] : memref<32x128xf32, #tpu.memory_space<vmem>>, vector<32x128xf32>
    %cst_51 = arith.constant dense<0.000000e+00> : vector<2x128xf32>
    %105 = tpu.matmul %103, %104, %cst_51 {dimension_numbers = #tpu.dot_dimension_numbers<[1], [0], [0], [1], [0, 0, 1, 1], [], []>} : vector<2x32xf32>, vector<32x128xf32>, vector<2x128xf32> -> vector<2x128xf32>
    %c0_52 = arith.constant 0 : index
    %c0_53 = arith.constant 0 : index
    %106 = vector.load %arg14[%c0_52, %c0_53] : memref<2x128xf32, #tpu.memory_space<vmem>>, vector<2x128xf32>
    tpu.vector_store %arg14[%c0_52, %c0_53], %105 {strides = array<i32>} : memref<2x128xf32, #tpu.memory_space<vmem>>, vector<2x128xf32>,
    return
  }
  func.func @transform_0(%arg0: i32) -> (i32, i32) {
    %c0_i32 = arith.constant 0 : i32
    %c0_i32_0 = arith.constant 0 : i32
    return %arg0, %c0_i32 : i32, i32
  }
  func.func @transform_1(%arg0: i32) -> (i32, i32) {
    %c0_i32 = arith.constant 0 : i32
    %c0_i32_0 = arith.constant 0 : i32
    return %arg0, %c0_i32 : i32, i32
  }
  func.func @transform_2(%arg0: i32) -> (i32, i32) {
    %c0_i32 = arith.constant 0 : i32
    %c0_i32_0 = arith.constant 0 : i32
    %c0_i32_1 = arith.constant 0 : i32
    return %c0_i32, %c0_i32_0 : i32, i32
  }
  func.func @transform_3(%arg0: i32) -> (i32, i32) {
    %c0_i32 = arith.constant 0 : i32
    %c0_i32_0 = arith.constant 0 : i32
    %c0_i32_1 = arith.constant 0 : i32
    return %c0_i32, %c0_i32_0 : i32, i32
  }
  func.func @transform_4(%arg0: i32) -> (i32, i32) {
    %c0_i32 = arith.constant 0 : i32
    %c0_i32_0 = arith.constant 0 : i32
    %c0_i32_1 = arith.constant 0 : i32
    return %c0_i32, %c0_i32_0 : i32, i32
  }
  func.func @transform_5(%arg0: i32) -> (i32, i32) {
    %c0_i32 = arith.constant 0 : i32
    %c0_i32_0 = arith.constant 0 : i32
    %c0_i32_1 = arith.constant 0 : i32
    return %c0_i32, %c0_i32_0 : i32, i32
  }
  func.func @transform_6(%arg0: i32) -> (i32, i32) {
    %c0_i32 = arith.constant 0 : i32
    %c0_i32_0 = arith.constant 0 : i32
    %c0_i32_1 = arith.constant 0 : i32
    return %c0_i32, %c0_i32_0 : i32, i32
  }
  func.func @transform_7(%arg0: i32) -> (i32, i32) {
    %c0_i32 = arith.constant 0 : i32
    %c0_i32_0 = arith.constant 0 : i32
    %c0_i32_1 = arith.constant 0 : i32
    return %c0_i32, %c0_i32_0 : i32, i32
  }
  func.func @transform_8(%arg0: i32) -> (i32, i32) {
    %c0_i32 = arith.constant 0 : i32
    %c0_i32_0 = arith.constant 0 : i32
    %c0_i32_1 = arith.constant 0 : i32
    return %c0_i32, %c0_i32_0 : i32, i32
  }
  func.func @transform_9(%arg0: i32) -> (i32, i32) {
    %c0_i32 = arith.constant 0 : i32
    %c0_i32_0 = arith.constant 0 : i32
    %c0_i32_1 = arith.constant 0 : i32
    return %c0_i32, %c0_i32_0 : i32, i32
  }
  func.func @transform_10(%arg0: i32) -> (i32, i32) {
    %c0_i32 = arith.constant 0 : i32
    %c0_i32_0 = arith.constant 0 : i32
    %c0_i32_1 = arith.constant 0 : i32
    return %c0_i32, %c0_i32_0 : i32, i32
  }
  func.func @transform_11(%arg0: i32) -> (i32, i32) {
    %c0_i32 = arith.constant 0 : i32
    %c0_i32_0 = arith.constant 0 : i32
    %c0_i32_1 = arith.constant 0 : i32
    return %c0_i32, %c0_i32_0 : i32, i32
  }
  func.func @transform_12(%arg0: i32) -> (i32, i32) {
    %c0_i32 = arith.constant 0 : i32
    %c0_i32_0 = arith.constant 0 : i32
    %c0_i32_1 = arith.constant 0 : i32
    return %c0_i32, %c0_i32_0 : i32, i32
  }
  func.func @transform_13(%arg0: i32) -> (i32, i32) {
    %c0_i32 = arith.constant 0 : i32
    %c0_i32_0 = arith.constant 0 : i32
    return %arg0, %c0_i32 : i32, i32
  }
}

</mosaic_0001>

<bundles_post_ra>
// kernel: tpu_custom_call.1
= control target key start
LH: loop header
LB: loop body
LE: loop exit
PB: predicated region body
PF: predicated region fallthrough
CT: control target
= control target key end

     0   :  { %18 = vsyncpa [#allocation3], 0  ;;  %s889_s0 = inlined_call_operand.hbm [shape: f32[16,32], index: 0, kind: input, shape index: {}]   ;;  %s890_s1 = inlined_call_operand.hbm [shape: f32[2,32], index: 1, kind: input, shape index: {}]   ;;  %s891_s2 = inlined_call_operand.vmem [shape: f32[32,32], index: 2, kind: input, shape index: {}]   ;;  %s892_s3 = inlined_call_operand.vmem [shape: f32[32,32], index: 3, kind: input, shape index: {}]   ;;  %s893_s4 = inlined_call_operand.vmem [shape: f32[32,32], index: 4, kind: input, shape index: {}]   ;;  %s894_s5 = inlined_call_operand.hbm [shape: f32[32,32], index: 5, kind: input, shape index: {}]   ;;  %s895_s6 = inlined_call_operand.vmem [shape: f32[1,32], index: 6, kind: input, shape index: {}]   ;;  %s896_s7 = inlined_call_operand.vmem [shape: f32[1,32], index: 7, kind: input, shape index: {}]   ;;  %s897_s8 = inlined_call_operand.hbm [shape: f32[32,64], index: 8, kind: input, shape index: {}]   ;;  %s898_s9 = inlined_call_operand.vmem [shape: f32[64,32], index: 9, kind: input, shape index: {}]   ;;  %s899_s10 = inlined_call_operand.vmem [shape: f32[1,32], index: 10, kind: input, shape index: {}]   ;;  %s900_s11 = inlined_call_operand.vmem [shape: f32[1,32], index: 11, kind: input, shape index: {}]   ;;  %s901_s12 = inlined_call_operand.hbm [shape: f32[32,128], index: 12, kind: input, shape index: {}]   ;;  %s902_s13 = inlined_call_operand.hbm [shape: f32[2,128], index: 13, kind: output, shape index: {}]  }
   0x1   :  { %19 = vsyncpa [#allocation6], 0 }
   0x2   :  { %20 = vsyncpa [#allocation9], 0  ;;  %s40_s27 = sshll.u32 %s890_s1, 4  ;;  %s41_s27 = int_to_ptr.hbm [resolvable:$true] %s40_s27 }
   0x3   :  { %21 = vsyncpa [#allocation4], 0  ;;  %s695_s28 = smov [#allocation5]   ;;  %s73_s15 = sshll.u32 %s897_s8, 4  ;;  %s74_s15 = int_to_ptr.hbm [resolvable:$true] %s73_s15 }
   0x4   :  { %s42_s29 = sshll.u32 %s695_s28, 4  ;;  %s696_s16 = smov [#allocation8]   ;;  %s43_s29 = int_to_ptr.vmem [resolvable:$true] %s42_s29 }
   0x5   :  { %45 = dma.hbm_to_vmem [thread:$0]  %s41_s27, 32, %s43_s29, [#allocation6]  }
   0x6   :  { %s75_s17 = sshll.u32 %s696_s16, 4  ;;  %s26_s20 = sshll.u32 %s889_s0, 4  ;;  %s76_s17 = int_to_ptr.vmem [resolvable:$true] %s75_s17  ;;  %s27_s20 = int_to_ptr.hbm [resolvable:$true] %s26_s20 }
   0x7   :  { %s697_s1 = smov 128   ;;  %s698_s21 = smov 8  }
   0x8   :  { %81 = dma.hbm_to_vmem [thread:$0]  %s74_s15, 512, %s76_s17, [#allocation9], %s697_s1, %s697_s1, %s698_s21  }
   0x9   :  { %s56_s24 = sshll.u32 %s894_s5, 4  ;;  %s699_s25 = smov [#allocation2]   ;;  %s57_s24 = int_to_ptr.hbm [resolvable:$true] %s56_s24 }
   0xa   :  { %s28_s26 = sshll.u32 %s699_s25, 4  ;;  %s700_s8 = smov [#allocation7]   ;;  %s29_s26 = int_to_ptr.vmem [resolvable:$true] %s28_s26 }
   0xb   :  { %34 = dma.hbm_to_vmem [thread:$0]  %s27_s20, 256, %s29_s26, [#allocation3], %s697_s1, %s697_s1, %s698_s21  }
   0xc   :  { %s58_s27 = sshll.u32 %s700_s8, 4  ;;  %s92_s0 = sshll.u32 %s901_s12, 4  ;;  %s59_s27 = int_to_ptr.vmem [resolvable:$true] %s58_s27  ;;  %s93_s0 = int_to_ptr.hbm [resolvable:$true] %s92_s0 }
   0xd   :  { %64 = dma.hbm_to_vmem [thread:$0]  %s57_s24, 512, %s59_s27, [#allocation6], %s697_s1, %s697_s1, %s698_s21  }
   0xe   :  { %s701_s30 = smov [#allocation10]  }
   0xf   :  { %s94_s14 = sshll.u32 %s701_s30, 4  ;;  %s95_s14 = int_to_ptr.vmem [resolvable:$true] %s94_s14 }
  0x10   :  { %100 = dma.hbm_to_vmem [thread:$0]  %s93_s0, 512, %s95_s14, [#allocation9], %s697_s1, %s697_s1, %s698_s21  }
  0x11   :  { %687 = dma.done.wait [#allocation3], 256  }
  0x12   :  { %688 = vsyncadd [#allocation3], 4294967040 }
  0x13   :  { %689 = dma.done.wait [#allocation6], 544  }
  0x14   :  { %690 = vsyncadd [#allocation6], 4294966752 }
  0x15   :  { %691 = dma.done.wait [#allocation9], 1024  }
  0x16   :  { %692 = vsyncadd [#allocation9], 4294966272  ;;  %v127_v0 = vld [vmem:[%s892_s3 + $0x18] sm:$0xff]  ;;  %v126_v1 = vld [vmem:[%s892_s3 + $0x10] sm:$0xff]  ;;  %vm128_vm0 = vcmask 261120   ;;  %v242_v18 = vlaneseq  ;;  %vm253_vm4 = vcmask 123904  }
  0x17   :  { %147 = vmatpush.msra.mxu0 %v127_v0  ;;  %v188_v2 = vld [vmem:[%s891_s2 + $0x18] sm:$0xff]  ;;  %v125_v3 = vld [vmem:[%s892_s3 + $0x8] sm:$0xff]  ;;  %v187_v4 = vld [vmem:[%s891_s2 + $0x10] sm:$0xff]  ;;  %vm265_vm5 = vcmask 130048   ;;  %vm321_vm6 = vcmask 254976   ;;  %v702_v46 = vmov 32.0  }
  0x18   :  { %204 = vmatpush.msra.mxu2 %v188_v2  ;;  %v124_v5 = vld [vmem:[%s892_s3] sm:$0xff]  ;;  %v186_v6 = vld [vmem:[%s891_s2 + $0x8] sm:$0xff]  ;;  %v813_v9 = vld [vmem:[#allocation5] sm:$0x3]  ;;  %v243_v19 = vshrl.u32 %v242_v18, 7  ;;  %v245_v21 = vand.u32 127, %v242_v18 }
  0x19   :  { %148 = vmatpush.msra.mxu0 %v126_v1  ;;  %v121_v7 = vld [vmem:[#allocation2] sm:$0xff]  ;;  %v122_v10 = vld [vmem:[#allocation2 + $0x8] sm:$0xff]  ;;  %v161_v14 = vld [vmem:[%s893_s4 + $0x18] sm:$0xff]  ;;  %vm403_vm11 = vcmask 523264   ;;  %s703_s29 = smov [#allocation11]  }
  0x1a   :  { %205 = vmatpush.msra.mxu2 %v187_v4  ;;  %v185_v8 = vld [vmem:[%s891_s2] sm:$0xff]  ;;  %v160_v15 = vld [vmem:[%s893_s4 + $0x10] sm:$0xff]  ;;  %174 = vmatpush.msra.mxu1 %v161_v14  ;;  %v159_v16 = vld [vmem:[%s893_s4 + $0x8] sm:$0xff]  ;;  %v248_v20 = vadd.s32 1, %v243_v19  ;;  %v246_v22 = vmul.u32 8, %v243_v19  ;;  %s491_s0 = sshll.u32 %s703_s29, 4  ;;  %s492_s0 = int_to_ptr.vmem [resolvable:$true] %s491_s0 }
  0x1b   :  { %149 = vmatpush.msra.mxu0 %v125_v3  ;;  %v158_v17 = vld [vmem:[%s893_s4] sm:$0xff]  ;;  %v292_v35 = vld [vmem:[#allocation7 + $0x18] sm:$0xff]  ;;  %v289_v38 = vld [vmem:[#allocation7] sm:$0xff]  ;;  %s493_s4 = sshll.u32 %s902_s13, 4  ;;  %s494_s4 = int_to_ptr.hbm [resolvable:$true] %s493_s4 }
  0x1c   :  { %206 = vmatpush.msra.mxu2 %v186_v6  ;;  %175 = vmatpush.msra.mxu1 %v160_v15  ;;  %v249_v23 = vmul.u32 8, %v248_v20  ;;  %vm247_vm1 = vcmp.ge.s32.totalorder %v245_v21, %v246_v22  ;;  %v291_v36 = vld [vmem:[#allocation7 + $0x10] sm:$0xff]  ;;  %v290_v37 = vld [vmem:[#allocation7 + $0x8] sm:$0xff]  ;;  %v362_v58 = vld [vmem:[#allocation8 + $0x18] sm:$0xff] }
  0x1d   :  { %150 = vmatpush.msra.mxu0 %v124_v5  ;;  %v361_v59 = vld [vmem:[#allocation8 + $0x10] sm:$0xff]  ;;  %v360_v60 = vld [vmem:[#allocation8 + $0x8] sm:$0xff]  ;;  %v359_v61 = vld [vmem:[#allocation8] sm:$0xff] }
  0x1e   :  { %505 = vmatmul.msk.f32.vlgmr.msra.gmra.mxu0 %vm128_vm0, %v121_v7  ;;  %207 = vmatpush.msra.mxu2 %v185_v8  ;;  %vm250_vm2 = vcmp.lt.s32.totalorder %v245_v21, %v249_v23  ;;  %v401_v14 = vld [vmem:[%s898_s9 + $0x30] sm:$0xff]  ;;  %v400_v15 = vld [vmem:[%s898_s9 + $0x28] sm:$0xff]  ;;  %v395_v20 = vld [vmem:[%s898_s9] sm:$0xff] }
  0x1f   :  { %509 = vmatmul.msk.f32.vlgmr.msra.gmra.mxu2 %vm128_vm0, %v813_v9  ;;  %176 = vmatpush.msra.mxu1 %v159_v16  ;;  %vm251_vm3 = vmand %vm247_vm1, %vm250_vm2  ;;  %v399_v16 = vld [vmem:[%s898_s9 + $0x20] sm:$0xff]  ;;  %v397_v18 = vld [vmem:[%s898_s9 + $0x10] sm:$0xff] }
  0x20   :  { %378 = vmatpush.msrb.mxu0 %v362_v58  ;;  %v396_v19 = vld [vmem:[%s898_s9 + $0x8] sm:$0xff] }
  0x21   :  { %177 = vmatpush.msra.mxu1 %v158_v17  ;;  %v398_v17 = vld [vmem:[%s898_s9 + $0x18] sm:$0xff] }
  0x22   :  { %507 = vmatmul.msk.f32.vlgmr.msra.gmra.mxu1 %vm128_vm0, %v121_v7  ;;  %379 = vmatpush.msrb.mxu0 %v361_v59  ;;  %v527_v7 = vld [vmem:[%s895_s6] ss:$0 sm:$0xff] }
  0x24   :  { %380 = vmatpush.msrb.mxu0 %v360_v60 }
  0x26   :  { %506 = vmatmul.msk.f32.gmra.mxu0 %vm128_vm0, %v122_v10 }
  0x27   :  { %381 = vmatpush.msrb.mxu0 %v359_v61 }
  0x2a   :  { %508 = vmatmul.msk.f32.gmra.mxu1 %vm128_vm0, %v122_v10  ;;  %v528_v10 = vld [vmem:[%s896_s7] ss:$0 sm:$0xff] }
  0x9b   :  { %v152_v11 = vpop.f32.mrf.mxu0 }
  0x9f   :  { %v179_v28 = vpop.f32.mrf.mxu1 }
  0xa2   :  { %v209_v13 = vpop.f32.mrf.mxu2 }
  0xa3   :  { %v155_v12 = vpop.f32.mrf.mxu0 }
  0xa4   :  { %510 = vmatpush.xpose.msk.msra.mxu3 %vm128_vm0, %v155_v12 }
  0xa7   :  { %v182_v29 = vpop.f32.mrf.mxu1 }
  0xa8   :  { %511 = vmatpush.xpose.msk.msra.mxu3 %vm128_vm0, %v152_v11  ;;  %283 = vmatpush.msrb.mxu2 %v182_v29 }
  0xaa   :  { %284 = vmatpush.msrb.mxu2 %v179_v28 }
  0xab   :  { %512 = vmatmul.msk.f32.vlgmr.msra.gmra.mxu3 %vm128_vm0, %v209_v13  ;;  %v402_v13 = vld [vmem:[%s898_s9 + $0x38] sm:$0xff] }
  0xac   :  { %308 = vmatpush.msrb.mxu3 %v292_v35  ;;  %415 = vmatpush.msrb.mxu1 %v402_v13 }
  0xae   :  { %309 = vmatpush.msrb.mxu3 %v291_v36  ;;  %416 = vmatpush.msrb.mxu1 %v401_v14 }
  0xb0   :  { %310 = vmatpush.msrb.mxu3 %v290_v37  ;;  %417 = vmatpush.msrb.mxu1 %v400_v15 }
  0xb2   :  { %311 = vmatpush.msrb.mxu3 %v289_v38  ;;  %418 = vmatpush.msrb.mxu1 %v399_v16 }
  0xb4   :  { %419 = vmatpush.msrb.mxu1 %v398_v17 }
  0xb6   :  { %420 = vmatpush.msrb.mxu1 %v397_v18 }
  0xb8   :  { %421 = vmatpush.msrb.mxu1 %v396_v19 }
  0xba   :  { %422 = vmatpush.msrb.mxu1 %v395_v20 }
 0x12e   :  { %v238_v24 = vpop.f32.mrf.mxu3 }
 0x12f   :  { %v241_v25 = vmul.f32 0.17677669, %v238_v24 }
 0x131   :  { %v252_v26 = vsel %vm251_vm3, %v241_v25, -inf }
 0x132   :  { %v254_v27 = vsel %vm253_vm4, %v252_v26, -inf }
 0x133   :  { %255 = vmax.xlane.f32.xlu0 %v254_v27 }
 0x1a6   :  { %v256_v30 = vpop.xlane.xlu0 %255 }
 0x1a7   :  { %v257_v31 = vsub.f32 %v252_v26, %v256_v30 }
 0x1a9   :  { %v258_v32 = vmul.f32 1.442695, %v257_v31 }
 0x1ab   :  { %531 = vpow2.f32 %v258_v32 }
 0x1b1   :  { %v532_v33 = vpop.eup %531 }
 0x1b2   :  { %v260_v34 = vsel %vm253_vm4, %v532_v33, 0.0 }
 0x1b3   :  { %261 = vadd.xlane.f32.xlu0 %v260_v34 }
 0x226   :  { %v262_v39 = vpop.xlane.xlu0 %261 }
 0x227   :  { %533 = vrcp.f32 %v262_v39  ;;  %v461_v39 = vld [vmem:[#allocation10 + $0x18] sm:$0xff] }
 0x228   :  { %535 = vrcp.f32 %v702_v46  ;;  %477 = vmatpush.msra.mxu2 %v461_v39 }
 0x22d   :  { %v534_v40 = vpop.eup %533 }
 0x22e   :  { %v264_v41 = vmul.f32 %v534_v40, %v532_v33  ;;  %v536_v47 = vpop.eup %535  ;;  %v460_v40 = vld [vmem:[#allocation10 + $0x10] sm:$0xff] }
 0x22f   :  { %v326_v48 = vmul.f32 32.0, %v536_v47  ;;  %vm330_vm7 = vweird.f32 %v536_v47  ;;  %478 = vmatpush.msra.mxu2 %v460_v40 }
 0x230   :  { %513 = vmatmul.msk.f32.vlgmr.msrb.gmra.mxu2 %vm265_vm5, %v264_v41  ;;  %v459_v41 = vld [vmem:[#allocation10 + $0x8] sm:$0xff] }
 0x231   :  { %v327_v49 = vsub.f32 1.0, %v326_v48  ;;  %479 = vmatpush.msra.mxu2 %v459_v41 }
 0x233   :  { %v328_v50 = vmul.f32 %v536_v47, %v327_v49 }
 0x235   :  { %v329_v51 = vadd.f32 %v536_v47, %v328_v50 }
 0x237   :  { %v839_v52 = vsel %vm330_vm7, %v536_v47, %v329_v51 }
 0x2b3   :  { %v286_v42 = vpop.f32.mrf.mxu2 }
 0x2b4   :  { %514 = vmatmul.msk.f32.vlgmr.msrb.gmra.mxu3 %vm128_vm0, %v286_v42  ;;  %v458_v42 = vld [vmem:[#allocation10] sm:$0xff] }
 0x2b5   :  { %480 = vmatpush.msra.mxu2 %v458_v42 }
 0x337   :  { %v313_v43 = vpop.f32.mrf.mxu3 }
 0x338   :  { %v320_v44 = vadd.f32 %v313_v43, %v813_v9 }
 0x33a   :  { %v322_v45 = vsel %vm321_vm6, %v320_v44, 0.0 }
 0x33b   :  { %323 = vadd.xlane.f32.xlu1 %v322_v45 }
 0x3ae   :  { %v324_v53 = vpop.xlane.xlu1 %323 }
 0x3af   :  { %v332_v54 = vmul.f32 %v839_v52, %v324_v53  ;;  %v529_v53 = vld [vmem:[%s899_s10] ss:$0 sm:$0xff] }
 0x3b1   :  { %v333_v55 = vsub.f32 %v320_v44, %v332_v54 }
 0x3b3   :  { %v334_v56 = vmul.f32 %v333_v55, %v333_v55 }
 0x3b5   :  { %v335_v57 = vsel %vm321_vm6, %v334_v56, 0.0 }
 0x3b6   :  { %336 = vadd.xlane.f32.xlu1 %v335_v57 }
 0x429   :  { %v337_v62 = vpop.xlane.xlu1 %336 }
 0x42a   :  { %v338_v63 = vmul.f32 %v337_v62, %v839_v52 }
 0x42c   :  { %v339_v0 = vadd.f32 1e-05, %v338_v63 }
 0x42e   :  { %537 = vrsqrt.f32 %v339_v0  ;;  %vm346_vm9 = vweird.f32 %v339_v0 }
 0x434   :  { %v538_v1 = vpop.eup %537 }
 0x435   :  { %v341_v2 = vmul.f32 %v538_v1, %v339_v0  ;;  %vm347_vm8 = vweird.f32 %v538_v1 }
 0x436   :  { %vm348_vm10 = vmor %vm346_vm9, %vm347_vm8 }
 0x437   :  { %v342_v3 = vmul.f32 %v538_v1, %v341_v2 }
 0x439   :  { %v343_v4 = vmul.f32 0.5, %v342_v3 }
 0x43b   :  { %v344_v5 = vsub.f32 1.5, %v343_v4 }
 0x43d   :  { %v345_v6 = vmul.f32 %v538_v1, %v344_v5 }
 0x43f   :  { %v349_v8 = vsel %vm348_vm10, %v538_v1, %v345_v6 }
 0x440   :  { %v350_v9 = vmul.f32 %v349_v8, %v333_v55 }
 0x442   :  { %v354_v11 = vmul.f32 %v527_v7, %v350_v9 }
 0x444   :  { %v358_v12 = vadd.f32 %v528_v10, %v354_v11 }
 0x446   :  { %515 = vmatmul.msk.f32.vlgmr.msrb.gmra.mxu0 %vm128_vm0, %v358_v12 }
 0x4c3   :  { %v383_v21 = vpop.f32.mrf.mxu0 }
 0x4c4   :  { %v386_v22 = vmul.f32 %v383_v21, %v383_v21 }
 0x4c6   :  { %v387_v23 = vmul.f32 %v386_v22, %v383_v21 }
 0x4c8   :  { %v388_v24 = vmul.f32 0.044715, %v387_v23 }
 0x4ca   :  { %v389_v25 = vadd.f32 %v388_v24, %v383_v21 }
 0x4cc   :  { %v390_v26 = vmul.f32 0.7978846, %v389_v25 }
 0x4ce   :  { %539 = vtanh.f32 %v390_v26 }
 0x4d4   :  { %v540_v27 = vpop.eup %539 }
 0x4d5   :  { %v392_v28 = vadd.f32 1.0, %v540_v27 }
 0x4d7   :  { %v393_v29 = vmul.f32 0.5, %v392_v28 }
 0x4d9   :  { %v394_v30 = vmul.f32 %v393_v29, %v383_v21 }
 0x4db   :  { %516 = vmatmul.msk.f32.vlgmr.msrb.gmra.mxu1 %vm403_vm11, %v394_v30 }
 0x558   :  { %v424_v31 = vpop.f32.mrf.mxu1 }
 0x559   :  { %v427_v32 = vadd.f32 %v424_v31, %v358_v12 }
 0x55b   :  { %v428_v33 = vsel %vm321_vm6, %v427_v32, 0.0 }
 0x55c   :  { %429 = vadd.xlane.f32.xlu2 %v428_v33 }
 0x5cf   :  { %v430_v34 = vpop.xlane.xlu2 %429 }
 0x5d0   :  { %v431_v35 = vmul.f32 %v430_v34, %v839_v52 }
 0x5d2   :  { %v432_v36 = vsub.f32 %v427_v32, %v431_v35 }
 0x5d4   :  { %v433_v37 = vmul.f32 %v432_v36, %v432_v36 }
 0x5d6   :  { %v434_v38 = vsel %vm321_vm6, %v433_v37, 0.0 }
 0x5d7   :  { %435 = vadd.xlane.f32.xlu2 %v434_v38 }
 0x64a   :  { %v436_v43 = vpop.xlane.xlu2 %435 }
 0x64b   :  { %v437_v44 = vmul.f32 %v436_v43, %v839_v52  ;;  %v530_v52 = vld [vmem:[%s900_s11] ss:$0 sm:$0xff] }
 0x64d   :  { %v438_v45 = vadd.f32 1e-05, %v437_v44 }
 0x64f   :  { %541 = vrsqrt.f32 %v438_v45  ;;  %vm445_vm13 = vweird.f32 %v438_v45 }
 0x655   :  { %v542_v46 = vpop.eup %541 }
 0x656   :  { %v440_v47 = vmul.f32 %v542_v46, %v438_v45  ;;  %vm446_vm12 = vweird.f32 %v542_v46 }
 0x657   :  { %vm447_vm14 = vmor %vm445_vm13, %vm446_vm12 }
 0x658   :  { %v441_v48 = vmul.f32 %v542_v46, %v440_v47 }
 0x65a   :  { %v442_v49 = vmul.f32 0.5, %v441_v48 }
 0x65c   :  { %v443_v50 = vsub.f32 1.5, %v442_v49 }
 0x65e   :  { %v444_v51 = vmul.f32 %v542_v46, %v443_v50 }
 0x660   :  { %v448_v54 = vsel %vm447_vm14, %v542_v46, %v444_v51 }
 0x661   :  { %v449_v55 = vmul.f32 %v448_v54, %v432_v36 }
 0x663   :  { %v453_v56 = vmul.f32 %v529_v53, %v449_v55 }
 0x665   :  { %v457_v57 = vadd.f32 %v530_v52, %v453_v56 }
 0x667   :  { %517 = vmatmul.msk.f32.vlgmr.msra.gmra.mxu2 %vm128_vm0, %v457_v57 }
 0x6ea   :  { %v482_v58 = vpop.f32.mrf.mxu2 }
 0x6eb   :  { %485 = vst [vmem:[#allocation11] sm:$0x3] %v482_v58 }
 0x6ec   :  { %496 = dma.vmem_to_hbm [thread:$0]  %s492_s0, 32, %s494_s4, [#allocation4]  }
 0x6ed   :  { %693 = dma.done.wait [#allocation4], 32  }
 0x6ee   :  { %694 = vsyncadd [#allocation4], 4294967264 }
 0x6ef   :  { %501 = vsyncpa [#allocation3], 1 }
 0x6f0   :  { %502 = vsyncpa [#allocation6], 1 }
 0x6f1   :  { %503 = vsyncpa [#allocation9], 1 }
 0x6f2   :  { %504 = vsyncpa [#allocation4], 1 }

</bundles_post_ra>
